<compile_context>
chip_gen: v7x
topology: tpu7x:2x2x1
jax: 0.10.0
libtpu: 0.0.40
codegen_flags: <defaults>
</compile_context>

<pallas_src>
import jax
import jax.numpy as jnp
from jax.experimental import pallas as pl
from jax.experimental.pallas import tpu as pltpu

# ---------------- model dimensions (module defaults) ----------------
INPUT_DIM = 784                           # 28*28
ENC_HIDDEN = 64                           # synthetic encoder hidden width
Z_DIM = 15
NUM_LABELS = 10
HIDDEN_DIM = (Z_DIM + NUM_LABELS) // 2    # = 12 (hidden_dim=None branch)


def _mlp_from_latent_kernel(
    x_ref,      # (TB, INPUT_DIM)          bf16
    eps_ref,    # (TB, Z_DIM)              f32
    w_enc_ref,  # (INPUT_DIM, ENC_HIDDEN)  bf16
    b_enc_ref,  # (1, ENC_HIDDEN)          f32
    w_mu_ref,   # (ENC_HIDDEN, Z_DIM)      f32
    b_mu_ref,   # (1, Z_DIM)               f32
    w_lv_ref,   # (ENC_HIDDEN, Z_DIM)      f32
    b_lv_ref,   # (1, Z_DIM)               f32
    w1_ref,     # (Z_DIM, HIDDEN_DIM)      f32
    b1_ref,     # (1, HIDDEN_DIM)          f32
    w2_ref,     # (HIDDEN_DIM, NUM_LABELS) f32
    b2_ref,     # (1, NUM_LABELS)          f32
    out_ref,    # (TB, NUM_LABELS)         f32
):
    # encoder.encode(x): h = relu(x @ W_enc + b_enc)  (bf16 operands, f32 accumulate)
    h_enc = jnp.dot(x_ref[...], w_enc_ref[...], preferred_element_type=jnp.float32)
    h_enc = jnp.maximum(h_enc + b_enc_ref[...], 0.0)

    # mu / logvar heads (tiny matmuls; hidden under the x DMA of the next tile)
    mu = jnp.dot(h_enc, w_mu_ref[...], preferred_element_type=jnp.float32) + b_mu_ref[...]
    logvar = jnp.dot(h_enc, w_lv_ref[...], preferred_element_type=jnp.float32) + b_lv_ref[...]

    # encoder.reparameterize(mu, logvar): z = mu + exp(0.5*logvar) * eps
    z = mu + jnp.exp(0.5 * logvar) * eps_ref[...]

    # h = relu(fc1(z))
    h = jnp.dot(z, w1_ref[...], preferred_element_type=jnp.float32) + b1_ref[...]
    h = jnp.maximum(h, 0.0)

    # softmax(fc2(h), dim=1)
    logits = jnp.dot(h, w2_ref[...], preferred_element_type=jnp.float32) + b2_ref[...]
    m = jnp.max(logits, axis=-1, keepdims=True)
    e = jnp.exp(logits - m)
    inv = pl.reciprocal(jnp.sum(e, axis=-1, keepdims=True), approx=True)
    out_ref[...] = (e * inv).astype(out_ref.dtype)


def my_mlp_from_latent_space_forward(x_nchw, params, eps, block_b=None):
    """Full forward pass of MyMLPFromLatentSpace (debug_mode=False)."""
    B = x_nchw.shape[0]
    # bf16 HBM copy of x halves the dominant HBM traffic; matmul accumulates in f32.
    x_flat = x_nchw.reshape(B, INPUT_DIM).astype(jnp.bfloat16)   # x.view(-1, input_dim)
    w_enc_bf16 = params["w_enc"].astype(jnp.bfloat16)
    eps = eps.astype(jnp.float32)

    if block_b is None:
        # Big tiles amortize the ~0.35us per-grid-step overhead; cap well inside
        # the default scoped VMEM of every generation (v5e 16 MiB / v6e 32 MiB /
        # v7x 32 MiB): 2 bufs x 1024 x 784 x 2B (bf16 x) ~= 3.2 MiB plus ~0.2 MiB
        # of resident weights.
        block_b = min(max(B, 8), 1024)
    # Keep the batch tile sublane-friendly and pad B up to a multiple of it.
    block_b = max(8, (block_b // 8) * 8)
    B_pad = ((B + block_b - 1) // block_b) * block_b
    if B_pad != B:
        x_flat = jnp.pad(x_flat, ((0, B_pad - B), (0, 0)))
        eps = jnp.pad(eps, ((0, B_pad - B), (0, 0)))
    grid = (B_pad // block_b,)

    def batch_spec(dim):
        return pl.BlockSpec((block_b, dim), lambda i: (i, 0))

    def resident(a):
        # Same block index for every grid step -> the array is DMA'd once and
        # stays VMEM-resident (Pallas does not re-fetch an unchanged block).
        return pl.BlockSpec(a.shape, lambda i: (0, 0))

    out = pl.pallas_call(
        _mlp_from_latent_kernel,
        out_shape=jax.ShapeDtypeStruct((B_pad, NUM_LABELS), jnp.float32),
        grid=grid,
        in_specs=[
            batch_spec(INPUT_DIM),          # x
            batch_spec(Z_DIM),              # eps
            resident(w_enc_bf16),
            resident(params["b_enc"]),
            resident(params["w_mu"]),
            resident(params["b_mu"]),
            resident(params["w_lv"]),
            resident(params["b_lv"]),
            resident(params["w1"]),
            resident(params["b1"]),
            resident(params["w2"]),
            resident(params["b2"]),
        ],
        out_specs=batch_spec(NUM_LABELS),
        compiler_params=pltpu.CompilerParams(
            # Batch tiles are independent -> shard across the 2 TCs on v7x.
            dimension_semantics=("parallel",),
        ),
    )(x_flat, eps, w_enc_bf16, params["b_enc"],
      params["w_mu"], params["b_mu"], params["w_lv"], params["b_lv"],
      params["w1"], params["b1"], params["w2"], params["b2"])
    return out[:B]


def init_params(key):
    """Deterministic synthetic parameters (PyTorch nn.Linear weights pre-transposed)."""
    ks = jax.random.split(key, 10)
    scale = 0.05
    return {
        "w_enc": scale * jax.random.normal(ks[0], (INPUT_DIM, ENC_HIDDEN), jnp.float32),
        "b_enc": scale * jax.random.normal(ks[1], (1, ENC_HIDDEN), jnp.float32),
        "w_mu":  scale * jax.random.normal(ks[2], (ENC_HIDDEN, Z_DIM), jnp.float32),
        "b_mu":  scale * jax.random.normal(ks[3], (1, Z_DIM), jnp.float32),
        "w_lv":  scale * jax.random.normal(ks[4], (ENC_HIDDEN, Z_DIM), jnp.float32),
        "b_lv":  scale * jax.random.normal(ks[5], (1, Z_DIM), jnp.float32),
        "w1":    scale * jax.random.normal(ks[6], (Z_DIM, HIDDEN_DIM), jnp.float32),
        "b1":    scale * jax.random.normal(ks[7], (1, HIDDEN_DIM), jnp.float32),
        "w2":    scale * jax.random.normal(ks[8], (HIDDEN_DIM, NUM_LABELS), jnp.float32),
        "b2":    scale * jax.random.normal(ks[9], (1, NUM_LABELS), jnp.float32),
    }


def reference_forward(x_nchw, params, eps):
    """Pure-JAX f32 reference (mirrors the PyTorch forward)."""
    B = x_nchw.shape[0]
    x = x_nchw.reshape(B, INPUT_DIM).astype(jnp.float32)
    h_enc = jnp.maximum(x @ params["w_enc"] + params["b_enc"], 0.0)
    mu = h_enc @ params["w_mu"] + params["b_mu"]
    logvar = h_enc @ params["w_lv"] + params["b_lv"]
    z = mu + jnp.exp(0.5 * logvar) * eps
    h = jnp.maximum(z @ params["w1"] + params["b1"], 0.0)
    logits = h @ params["w2"] + params["b2"]
    return jax.nn.softmax(logits, axis=1)


if __name__ == "__main__":
    key = jax.random.PRNGKey(0)
    k_x, k_eps, k_p = jax.random.split(key, 3)

    B = 16
    x = jax.random.normal(k_x, (B, 1, 28, 28), jnp.float32)   # NCHW input
    eps = jax.random.normal(k_eps, (B, Z_DIM), jnp.float32)   # reparameterization noise
    params = init_params(k_p)

    # block_b=8 -> grid=(2,) so the batch-tiled pipeline path is exercised.
    y_hat = my_mlp_from_latent_space_forward(x, params, eps, block_b=8)
    y_hat = jax.block_until_ready(y_hat)

    y_ref = reference_forward(x, params, eps)
    assert y_hat.shape == (B, NUM_LABELS)
    # Tolerances account for bf16 x / W_enc and the approximate EUP reciprocal
    # in the softmax denominator.
    assert bool(jnp.all(jnp.isfinite(y_hat)))
    assert jnp.allclose(jnp.sum(y_hat, axis=1), 1.0, atol=5e-3)
    assert jnp.allclose(y_hat, y_ref, atol=1e-2, rtol=1e-2)

    print("KERNEL_OK")
</pallas_src>

<mosaic_0001>
module attributes {stable_mosaic.version = 11 : i64} {
  func.func @_mlp_from_latent_kernel(%arg0: i32, %arg1: memref<8x784xbf16, #tpu.memory_space<vmem>>, %arg2: memref<8x15xf32, #tpu.memory_space<vmem>>, %arg3: memref<784x64xbf16, #tpu.memory_space<vmem>>, %arg4: memref<1x64xf32, #tpu.memory_space<vmem>>, %arg5: memref<64x15xf32, #tpu.memory_space<vmem>>, %arg6: memref<1x15xf32, #tpu.memory_space<vmem>>, %arg7: memref<64x15xf32, #tpu.memory_space<vmem>>, %arg8: memref<1x15xf32, #tpu.memory_space<vmem>>, %arg9: memref<15x12xf32, #tpu.memory_space<vmem>>, %arg10: memref<1x12xf32, #tpu.memory_space<vmem>>, %arg11: memref<12x10xf32, #tpu.memory_space<vmem>>, %arg12: memref<1x10xf32, #tpu.memory_space<vmem>>, %arg13: memref<8x10xf32, #tpu.memory_space<vmem>>) attributes {dimension_semantics = [#tpu.dimension_semantics<parallel>], iteration_bounds = array<i64: 2>, scalar_prefetch = 0 : i64, scratch_operands = 0 : i64, tpu.core_type = #tpu.core_type<tc>, window_params = [{transform_indices = @transform_0, window_bounds = array<i64: 8, 784>}, {transform_indices = @transform_1, window_bounds = array<i64: 8, 15>}, {pipeline_mode = #tpu.pipeline_mode<synchronous>, transform_indices = @transform_2, window_bounds = array<i64: 784, 64>}, {pipeline_mode = #tpu.pipeline_mode<synchronous>, transform_indices = @transform_3, window_bounds = array<i64: 1, 64>}, {pipeline_mode = #tpu.pipeline_mode<synchronous>, transform_indices = @transform_4, window_bounds = array<i64: 64, 15>}, {pipeline_mode = #tpu.pipeline_mode<synchronous>, transform_indices = @transform_5, window_bounds = array<i64: 1, 15>}, {pipeline_mode = #tpu.pipeline_mode<synchronous>, transform_indices = @transform_6, window_bounds = array<i64: 64, 15>}, {pipeline_mode = #tpu.pipeline_mode<synchronous>, transform_indices = @transform_7, window_bounds = array<i64: 1, 15>}, {pipeline_mode = #tpu.pipeline_mode<synchronous>, transform_indices = @transform_8, window_bounds = array<i64: 15, 12>}, {pipeline_mode = #tpu.pipeline_mode<synchronous>, transform_indices = @transform_9, window_bounds = array<i64: 1, 12>}, {pipeline_mode = #tpu.pipeline_mode<synchronous>, transform_indices = @transform_10, window_bounds = array<i64: 12, 10>}, {pipeline_mode = #tpu.pipeline_mode<synchronous>, transform_indices = @transform_11, window_bounds = array<i64: 1, 10>}, {transform_indices = @transform_12, window_bounds = array<i64: 8, 10>}]} {
    %c0 = arith.constant 0 : index
    %c0_0 = arith.constant 0 : index
    %0 = vector.load %arg1[%c0, %c0_0] : memref<8x784xbf16, #tpu.memory_space<vmem>>, vector<8x784xbf16>
    %c0_1 = arith.constant 0 : index
    %c0_2 = arith.constant 0 : index
    %1 = vector.load %arg3[%c0_1, %c0_2] : memref<784x64xbf16, #tpu.memory_space<vmem>>, vector<784x64xbf16>
    %cst = arith.constant dense<0.000000e+00> : vector<8x64xf32>
    %2 = tpu.matmul %0, %1, %cst {dimension_numbers = #tpu.dot_dimension_numbers<[1], [0], [0], [1], [0, 0, 1, 1], [], []>} : vector<8x784xbf16>, vector<784x64xbf16>, vector<8x64xf32> -> vector<8x64xf32>
    %c0_3 = arith.constant 0 : index
    %c0_4 = arith.constant 0 : index
    %3 = vector.load %arg4[%c0_3, %c0_4] : memref<1x64xf32, #tpu.memory_space<vmem>>, vector<1x64xf32>
    %4 = vector.broadcast %3 : vector<1x64xf32> to vector<8x64xf32>
    %5 = arith.addf %2, %4 : vector<8x64xf32>
    %cst_5 = arith.constant 0.000000e+00 : f32
    %6 = vector.broadcast %cst_5 : f32 to vector<8x64xf32>
    %7 = arith.maximumf %5, %6 : vector<8x64xf32>
    %c0_6 = arith.constant 0 : index
    %c0_7 = arith.constant 0 : index
    %8 = vector.load %arg5[%c0_6, %c0_7] : memref<64x15xf32, #tpu.memory_space<vmem>>, vector<64x15xf32>
    %cst_8 = arith.constant dense<0.000000e+00> : vector<8x15xf32>
    %9 = tpu.matmul %7, %8, %cst_8 {dimension_numbers = #tpu.dot_dimension_numbers<[1], [0], [0], [1], [0, 0, 1, 1], [], []>} : vector<8x64xf32>, vector<64x15xf32>, vector<8x15xf32> -> vector<8x15xf32>
    %c0_9 = arith.constant 0 : index
    %c0_10 = arith.constant 0 : index
    %10 = vector.load %arg6[%c0_9, %c0_10] : memref<1x15xf32, #tpu.memory_space<vmem>>, vector<1x15xf32>
    %11 = vector.broadcast %10 : vector<1x15xf32> to vector<8x15xf32>
    %12 = arith.addf %9, %11 : vector<8x15xf32>
    %c0_11 = arith.constant 0 : index
    %c0_12 = arith.constant 0 : index
    %13 = vector.load %arg7[%c0_11, %c0_12] : memref<64x15xf32, #tpu.memory_space<vmem>>, vector<64x15xf32>
    %cst_13 = arith.constant dense<0.000000e+00> : vector<8x15xf32>
    %14 = tpu.matmul %7, %13, %cst_13 {dimension_numbers = #tpu.dot_dimension_numbers<[1], [0], [0], [1], [0, 0, 1, 1], [], []>} : vector<8x64xf32>, vector<64x15xf32>, vector<8x15xf32> -> vector<8x15xf32>
    %c0_14 = arith.constant 0 : index
    %c0_15 = arith.constant 0 : index
    %15 = vector.load %arg8[%c0_14, %c0_15] : memref<1x15xf32, #tpu.memory_space<vmem>>, vector<1x15xf32>
    %16 = vector.broadcast %15 : vector<1x15xf32> to vector<8x15xf32>
    %17 = arith.addf %14, %16 : vector<8x15xf32>
    %cst_16 = arith.constant 5.000000e-01 : f32
    %18 = vector.broadcast %cst_16 : f32 to vector<8x15xf32>
    %19 = arith.mulf %18, %17 : vector<8x15xf32>
    %20 = math.exp %19 : vector<8x15xf32>
    %c0_17 = arith.constant 0 : index
    %c0_18 = arith.constant 0 : index
    %21 = vector.load %arg2[%c0_17, %c0_18] : memref<8x15xf32, #tpu.memory_space<vmem>>, vector<8x15xf32>
    %22 = arith.mulf %20, %21 : vector<8x15xf32>
    %23 = arith.addf %12, %22 : vector<8x15xf32>
    %c0_19 = arith.constant 0 : index
    %c0_20 = arith.constant 0 : index
    %24 = vector.load %arg9[%c0_19, %c0_20] : memref<15x12xf32, #tpu.memory_space<vmem>>, vector<15x12xf32>
    %cst_21 = arith.constant dense<0.000000e+00> : vector<8x12xf32>
    %25 = tpu.matmul %23, %24, %cst_21 {dimension_numbers = #tpu.dot_dimension_numbers<[1], [0], [0], [1], [0, 0, 1, 1], [], []>} : vector<8x15xf32>, vector<15x12xf32>, vector<8x12xf32> -> vector<8x12xf32>
    %c0_22 = arith.constant 0 : index
    %c0_23 = arith.constant 0 : index
    %26 = vector.load %arg10[%c0_22, %c0_23] : memref<1x12xf32, #tpu.memory_space<vmem>>, vector<1x12xf32>
    %27 = vector.broadcast %26 : vector<1x12xf32> to vector<8x12xf32>
    %28 = arith.addf %25, %27 : vector<8x12xf32>
    %cst_24 = arith.constant 0.000000e+00 : f32
    %29 = vector.broadcast %cst_24 : f32 to vector<8x12xf32>
    %30 = arith.maximumf %28, %29 : vector<8x12xf32>
    %c0_25 = arith.constant 0 : index
    %c0_26 = arith.constant 0 : index
    %31 = vector.load %arg11[%c0_25, %c0_26] : memref<12x10xf32, #tpu.memory_space<vmem>>, vector<12x10xf32>
    %cst_27 = arith.constant dense<0.000000e+00> : vector<8x10xf32>
    %32 = tpu.matmul %30, %31, %cst_27 {dimension_numbers = #tpu.dot_dimension_numbers<[1], [0], [0], [1], [0, 0, 1, 1], [], []>} : vector<8x12xf32>, vector<12x10xf32>, vector<8x10xf32> -> vector<8x10xf32>
    %c0_28 = arith.constant 0 : index
    %c0_29 = arith.constant 0 : index
    %33 = vector.load %arg12[%c0_28, %c0_29] : memref<1x10xf32, #tpu.memory_space<vmem>>, vector<1x10xf32>
    %34 = vector.broadcast %33 : vector<1x10xf32> to vector<8x10xf32>
    %35 = arith.addf %32, %34 : vector<8x10xf32>
    %cst_30 = arith.constant dense<0xFF800000> : vector<8xf32>
    %36 = vector.multi_reduction <maximumf>, %35, %cst_30 [1] : vector<8x10xf32> to vector<8xf32>
    %37 = vector.shape_cast %36 : vector<8xf32> to vector<8x1xf32>
    %38 = vector.broadcast %37 : vector<8x1xf32> to vector<8x10xf32>
    %39 = arith.subf %35, %38 : vector<8x10xf32>
    %40 = math.exp %39 : vector<8x10xf32>
    %cst_31 = arith.constant dense<0.000000e+00> : vector<8xf32>
    %41 = vector.multi_reduction <add>, %40, %cst_31 [1] : vector<8x10xf32> to vector<8xf32>
    %42 = vector.shape_cast %41 : vector<8xf32> to vector<8x1xf32>
    %43 = tpu.reciprocal %42 {approx = true} : vector<8x1xf32> -> vector<8x1xf32>
    %44 = vector.broadcast %43 : vector<8x1xf32> to vector<8x10xf32>
    %45 = arith.mulf %40, %44 : vector<8x10xf32>
    %c0_32 = arith.constant 0 : index
    %c0_33 = arith.constant 0 : index
    %46 = vector.load %arg13[%c0_32, %c0_33] : memref<8x10xf32, #tpu.memory_space<vmem>>, vector<8x10xf32>
    tpu.vector_store %arg13[%c0_32, %c0_33], %45 {strides = array<i32>} : memref<8x10xf32, #tpu.memory_space<vmem>>, vector<8x10xf32>,
    return
  }
  func.func @transform_0(%arg0: i32) -> (i32, i32) {
    %c0_i32 = arith.constant 0 : i32
    %c0_i32_0 = arith.constant 0 : i32
    return %arg0, %c0_i32 : i32, i32
  }
  func.func @transform_1(%arg0: i32) -> (i32, i32) {
    %c0_i32 = arith.constant 0 : i32
    %c0_i32_0 = arith.constant 0 : i32
    return %arg0, %c0_i32 : i32, i32
  }
  func.func @transform_2(%arg0: i32) -> (i32, i32) {
    %c0_i32 = arith.constant 0 : i32
    %c0_i32_0 = arith.constant 0 : i32
    %c0_i32_1 = arith.constant 0 : i32
    return %c0_i32, %c0_i32_0 : i32, i32
  }
  func.func @transform_3(%arg0: i32) -> (i32, i32) {
    %c0_i32 = arith.constant 0 : i32
    %c0_i32_0 = arith.constant 0 : i32
    %c0_i32_1 = arith.constant 0 : i32
    return %c0_i32, %c0_i32_0 : i32, i32
  }
  func.func @transform_4(%arg0: i32) -> (i32, i32) {
    %c0_i32 = arith.constant 0 : i32
    %c0_i32_0 = arith.constant 0 : i32
    %c0_i32_1 = arith.constant 0 : i32
    return %c0_i32, %c0_i32_0 : i32, i32
  }
  func.func @transform_5(%arg0: i32) -> (i32, i32) {
    %c0_i32 = arith.constant 0 : i32
    %c0_i32_0 = arith.constant 0 : i32
    %c0_i32_1 = arith.constant 0 : i32
    return %c0_i32, %c0_i32_0 : i32, i32
  }
  func.func @transform_6(%arg0: i32) -> (i32, i32) {
    %c0_i32 = arith.constant 0 : i32
    %c0_i32_0 = arith.constant 0 : i32
    %c0_i32_1 = arith.constant 0 : i32
    return %c0_i32, %c0_i32_0 : i32, i32
  }
  func.func @transform_7(%arg0: i32) -> (i32, i32) {
    %c0_i32 = arith.constant 0 : i32
    %c0_i32_0 = arith.constant 0 : i32
    %c0_i32_1 = arith.constant 0 : i32
    return %c0_i32, %c0_i32_0 : i32, i32
  }
  func.func @transform_8(%arg0: i32) -> (i32, i32) {
    %c0_i32 = arith.constant 0 : i32
    %c0_i32_0 = arith.constant 0 : i32
    %c0_i32_1 = arith.constant 0 : i32
    return %c0_i32, %c0_i32_0 : i32, i32
  }
  func.func @transform_9(%arg0: i32) -> (i32, i32) {
    %c0_i32 = arith.constant 0 : i32
    %c0_i32_0 = arith.constant 0 : i32
    %c0_i32_1 = arith.constant 0 : i32
    return %c0_i32, %c0_i32_0 : i32, i32
  }
  func.func @transform_10(%arg0: i32) -> (i32, i32) {
    %c0_i32 = arith.constant 0 : i32
    %c0_i32_0 = arith.constant 0 : i32
    %c0_i32_1 = arith.constant 0 : i32
    return %c0_i32, %c0_i32_0 : i32, i32
  }
  func.func @transform_11(%arg0: i32) -> (i32, i32) {
    %c0_i32 = arith.constant 0 : i32
    %c0_i32_0 = arith.constant 0 : i32
    %c0_i32_1 = arith.constant 0 : i32
    return %c0_i32, %c0_i32_0 : i32, i32
  }
  func.func @transform_12(%arg0: i32) -> (i32, i32) {
    %c0_i32 = arith.constant 0 : i32
    %c0_i32_0 = arith.constant 0 : i32
    return %arg0, %c0_i32 : i32, i32
  }
}

</mosaic_0001>

<bundles_post_ra>
// kernel: tpu_custom_call.1
= control target key start
LH: loop header
LB: loop body
LE: loop exit
PB: predicated region body
PF: predicated region fallthrough
CT: control target
= control target key end

     0   :  { %17 = vsyncpa [#allocation3], 0  ;;  %s2339_s0 = inlined_call_operand.vmem [shape: bf16[16,784], index: 0, kind: input, shape index: {}]   ;;  %s2340_s1 = inlined_call_operand.vmem [shape: f32[16,15], index: 1, kind: input, shape index: {}]   ;;  %s2341_s2 = inlined_call_operand.vmem [shape: bf16[784,64], index: 2, kind: input, shape index: {}]   ;;  %s2342_s3 = inlined_call_operand.vmem [shape: f32[1,64], index: 3, kind: input, shape index: {}]   ;;  %s2343_s4 = inlined_call_operand.vmem [shape: f32[64,15], index: 4, kind: input, shape index: {}]   ;;  %s2344_s5 = inlined_call_operand.vmem [shape: f32[1,15], index: 5, kind: input, shape index: {}]   ;;  %s2345_s6 = inlined_call_operand.vmem [shape: f32[64,15], index: 6, kind: input, shape index: {}]   ;;  %s2346_s7 = inlined_call_operand.vmem [shape: f32[1,15], index: 7, kind: input, shape index: {}]   ;;  %s2347_s8 = inlined_call_operand.vmem [shape: f32[15,12], index: 8, kind: input, shape index: {}]   ;;  %s2348_s9 = inlined_call_operand.vmem [shape: f32[1,12], index: 9, kind: input, shape index: {}]   ;;  %s2349_s10 = inlined_call_operand.vmem [shape: f32[12,10], index: 10, kind: input, shape index: {}]   ;;  %s2350_s11 = inlined_call_operand.vmem [shape: f32[1,10], index: 11, kind: input, shape index: {}]   ;;  %s2351_s12 = inlined_call_operand.hbm [shape: f32[16,10], index: 12, kind: output, shape index: {}]  }
   0x1   :  { %19 = vsyncpa [#allocation3 + $0x1], 0  ;;  %s1976_s21 = smov 0   ;;  %s1978_s22 = smov 0  }
   0x2   :  { %s1980_s23 = smov 0   ;;  %s1982_s24 = smov 0  }
   0x3 LB: > { %2355 = sst [smem:[#allocation5_spill]] %s1900_s23  ;;  %s1997_s25 = sadd.s32 4294967295, %s1904_s24   ;;  %s1904_s24 = sphi %s1982_s24, %s2360_s24   ;;  %s1900_s23 = sphi %s1980_s23, %s2362_s23   ;;  %s1896_s22 = sphi %s1978_s22, %s2364_s22   ;;  %s1892_s21 = sphi %s1976_s21, %s2363_s21  }
   0x4   : > { %s1475_s26 = sadd.s32 4294967294, %s1904_s24   ;;  %s2001_s27 = sadd.s32 1, %s1904_s24  }
   0x5   : > { %2356 = sst [smem:[#allocation6_spill]] %s2001_s27  ;;  %s294_s28 = sadd.s32 1, %s1900_s23 }
   0x6   : > { %s291_s29 = ssub.s32 %s1904_s24, %s2001_s27  ;;  %p304_p0 = scmp.ne.s32.totalorder %s1900_s23, %s1896_s22 }
   0x7   : > { %p292_p1 = scmp.eq.s32.totalorder %s291_s29, 0  ;;  %p305_p2 = scmp.eq.s32.totalorder %s1997_s25, 1 }
   0x8   : > { %p310_p3 = scmp.ne.s32.totalorder %s1896_s22, %s1892_s21  ;;  %p311_p4 = scmp.eq.s32.totalorder %s1475_s26, 1 }
   0x9   : > { %s2012_s30 = scalar_select %p292_p1, %s1900_s23, %s294_s28  }
   0xa   : > { %p2014_p5 = por %p305_p2, %p304_p0  ;;  %p2018_p6 = por %p311_p4, %p310_p3 }
   0xb   : > { %2357 = sst [smem:[#allocation7_spill]] %s2012_s30  ;;  %p1478_p7 = scmp.ge.s32.totalorder %s1904_s24, 1 }
   0xc   : > { %p374_p8 = scmp.lt.s32.totalorder %s1904_s24, 3 }
   0xe   : > { %p375_p9 = pnand %p1478_p7, %p374_p8 }
   0xf   : > { %v1780_v0 = vld [vmem:[%s2341_s2 + $0x40] sm:$0xff] (!%p375_p9)   ;;  %v1784_v4 = vld [vmem:[%s2341_s2 + $0x48] sm:$0xff] (!%p375_p9)   ;;  %v1788_v8 = vld [vmem:[%s2341_s2 + $0x50] sm:$0xff] (!%p375_p9)   ;;  %p420_p10 = scmp.lt.s32.totalorder (!%p375_p9), %s1997_s25, 1  ;;  %v1906_v41 = vmov (!%p375_p9), 0.0   ;;  %vm1907_vm0 = vmmov (!%p375_p9), 0  }
  0x10   : > { %378 = sbr.rel (%p375_p9) target bundleno = 1308 (0x51c), region = 68  ;;  %v1781_v1 = vld [vmem:[%s2341_s2] sm:$0xff] (!%p375_p9)   ;;  %1554 = vmatprep.subr.bf16.mxu0 (!%p375_p9), %v1780_v0  ;;  %v1785_v5 = vld [vmem:[%s2341_s2 + $0x8] sm:$0xff] (!%p375_p9)   ;;  %v1789_v9 = vld [vmem:[%s2341_s2 + $0x10] sm:$0xff] (!%p375_p9)   ;;  %vm857_vm1 = vcmask (!%p375_p9), 130048   ;;  %v1908_v63 = vmov (!%p375_p9), 0.0|0.0  }
  0x11   : > { %v1782_v2 = vld [vmem:[%s2341_s2 + $0xc0] sm:$0xff] (!%p375_p9)   ;;  %1555 = vmatpush3.bf16.msra.mxu0 (!%p375_p9), %v1781_v1  ;;  %v1786_v6 = vld [vmem:[%s2341_s2 + $0xc8] sm:$0xff] (!%p375_p9)   ;;  %v1790_v10 = vld [vmem:[%s2341_s2 + $0xd0] sm:$0xff] (!%p375_p9)   ;;  %vm1037_vm2 = vcmask (!%p375_p9), 523264   ;;  %vm1215_vm3 = vcmask (!%p375_p9), 1046528   ;;  %vm1909_vm4 = vmmov (!%p375_p9), 1  }
  0x12   : > { %v1783_v3 = vld [vmem:[%s2341_s2 + $0x80] sm:$0xff] (!%p375_p9)   ;;  %1576 = vmatprep.subr.bf16.mxu1 (!%p375_p9), %v1782_v2  ;;  %1556 = vmatprep.subr.bf16.mxu0 (!%p375_p9), %v1784_v4  ;;  %v1787_v7 = vld [vmem:[%s2341_s2 + $0x88] sm:$0xff] (!%p375_p9)   ;;  %v1791_v11 = vld [vmem:[%s2341_s2 + $0x90] sm:$0xff] (!%p375_p9)   ;;  %vm1211_vm6 = vcmask (!%p375_p9), 121856   ;;  %vm1303_vm7 = vcmask (!%p375_p9), 1043456   ;;  %vm1299_vm9 = vcmask (!%p375_p9), 97280  }
  0x13   : > { %1577 = vmatpush3.bf16.msra.mxu1 (!%p375_p9), %v1783_v3  ;;  %v1792_v12 = vld [vmem:[%s2341_s2 + $0x58] sm:$0xff] (!%p375_p9)   ;;  %v1796_v16 = vld [vmem:[%s2341_s2 + $0x60] sm:$0xff] (!%p375_p9)   ;;  %v1800_v20 = vld [vmem:[%s2341_s2 + $0x68] sm:$0xff] (!%p375_p9)   ;;  %vm1377_vm10 = vcmask (!%p375_p9), 80896   ;;  %s417_s30 = sand.u32 (!%p375_p9), 1, %s1896_s22   ;;  %s1551_s15 = sshll.u32 (!%p375_p9), %s1997_s25, 7 }
  0x14   : > { %1578 = vmatprep.subr.bf16.mxu1 (!%p375_p9), %v1786_v6  ;;  %v1793_v13 = vld [vmem:[%s2341_s2 + $0x18] sm:$0xff] (!%p375_p9)   ;;  %v1797_v17 = vld [vmem:[%s2341_s2 + $0x20] sm:$0xff] (!%p375_p9)   ;;  %v1801_v21 = vld [vmem:[%s2341_s2 + $0x28] sm:$0xff] (!%p375_p9)   ;;  %s2296_s26 = scalar_lea.hbm (!%p375_p9), %s2351_s12, %s1551_s15 }
  0x15   : > { %1557 = vmatpush3.bf16.msra.mxu0 (!%p375_p9), %v1785_v5  ;;  %v1794_v14 = vld [vmem:[%s2341_s2 + $0xd8] sm:$0xff] (!%p375_p9)   ;;  %v1798_v18 = vld [vmem:[%s2341_s2 + $0xe0] sm:$0xff] (!%p375_p9)   ;;  %v1802_v22 = vld [vmem:[%s2341_s2 + $0xe8] sm:$0xff] (!%p375_p9)  }
  0x16   : > { %1558 = vmatprep.subr.bf16.mxu0 (!%p375_p9), %v1788_v8  ;;  %v1795_v15 = vld [vmem:[%s2341_s2 + $0x98] sm:$0xff] (!%p375_p9)   ;;  %v1799_v19 = vld [vmem:[%s2341_s2 + $0xa0] sm:$0xff] (!%p375_p9)   ;;  %v1803_v23 = vld [vmem:[%s2341_s2 + $0xa8] sm:$0xff] (!%p375_p9)  }
  0x17   : > { %1579 = vmatpush3.bf16.msra.mxu1 %v1787_v7  ;;  %s2089_s17 = scalar_select %p420_p10, %s1997_s25, 1  ;;  %v1804_v24 = vld [vmem:[%s2341_s2 + $0x70] sm:$0xff]   ;;  %v1808_v28 = vld [vmem:[%s2341_s2 + $0x78] sm:$0xff]   ;;  %v1815_v35 = vld [vmem:[%s2341_s2 + $0x140] sm:$0xff]  }
  0x18   : > { %1580 = vmatprep.subr.bf16.mxu1 %v1790_v10  ;;  %v1805_v25 = vld [vmem:[%s2341_s2 + $0x30] sm:$0xff]   ;;  %v1809_v29 = vld [vmem:[%s2341_s2 + $0x38] sm:$0xff]   ;;  %v1818_v39 = vld [vmem:[%s2341_s2 + $0x100] sm:$0xff]   ;;  %s1910_s25 = smov [#allocation2]  }
  0x19   : > { %1559 = vmatpush3.bf16.msra.mxu0 %v1789_v9  ;;  %s1736_s16 = smul.u32 28, %s2089_s17  ;;  %v1806_v26 = vld [vmem:[%s2341_s2 + $0xf0] sm:$0xff]   ;;  %v1810_v30 = vld [vmem:[%s2341_s2 + $0xf8] sm:$0xff]   ;;  %v1819_v40 = vld [vmem:[%s2341_s2 + $0x148] sm:$0xff]  }
  0x1a   : > { %1560 = vmatprep.subr.bf16.mxu0 %v1792_v12  ;;  %v1807_v27 = vld [vmem:[%s2341_s2 + $0xb0] sm:$0xff]   ;;  %v1814_v34 = vld [vmem:[%s2341_s2 + $0xb8] sm:$0xff]   ;;  %v1820_v42 = vld [vmem:[%s2341_s2 + $0x108] sm:$0xff]  }
  0x1b   : > { %1581 = vmatpush3.bf16.msra.mxu1 %v1791_v11  ;;  %s2119_s23 = scalar_lea.vmem %s2339_s0, %s1736_s16  ;;  %v1821_v43 = vld [vmem:[%s2341_s2 + $0x150] sm:$0xff]   ;;  %v1823_v45 = vld [vmem:[%s2341_s2 + $0x158] sm:$0xff]   ;;  %v1825_v47 = vld [vmem:[%s2341_s2 + $0x160] sm:$0xff]   ;;  %s1481_s16 = sshll.u32 %s2089_s17, 3 }
  0x1c   : > { %1582 = vmatprep.subr.bf16.mxu1 %v1794_v14  ;;  %v430_v31 = vld [vmem:[%s2119_s23] sm:$0xff]  ;;  %v431_v36 = vld [vmem:[%s2119_s23 + $0x8] sm:$0xff]  ;;  %v1822_v44 = vld [vmem:[%s2341_s2 + $0x110] sm:$0xff]   ;;  %s428_s29 = scalar_lea.vmem %s2340_s1, %s1481_s16  ;;  %s1846_s16 = sshll.u32 %s1910_s25, 4  ;;  %s1847_s16 = int_to_ptr.vmem [resolvable:$false] %s1846_s16 }
  0x1d   : > { %1561 = vmatpush3.bf16.msra.mxu0 %v1793_v13  ;;  %v1483_v32 = vcombine.low %v430_v31, %v430_v31  ;;  %v1484_v33 = vcombine.high %v430_v31, %v430_v31  ;;  %v1485_v37 = vcombine.low %v431_v36, %v431_v36  ;;  %v1486_v38 = vcombine.high %v431_v36, %v431_v36  ;;  %v1824_v46 = vld [vmem:[%s2341_s2 + $0x118] sm:$0xff]   ;;  %v1826_v48 = vld [vmem:[%s2341_s2 + $0x120] sm:$0xff]   ;;  %v1827_v49 = vld [vmem:[%s2341_s2 + $0x168] sm:$0xff]   ;;  %s1848_s28 = scalar_lea.vmem %s1847_s16, 256 }
  0x1e   : > { %1562 = vmatprep.subr.bf16.mxu0 %v1796_v16  ;;  %v1833_v50 = vld [vmem:[%s2341_s2 + $0x180] sm:$0xff]   ;;  %v432_v51 = vld [vmem:[%s2119_s23 + $0x10] sm:$0xff]  ;;  %v1813_v52 = vld [vmem:[%s2119_s23 + $0x18] ss:$0 sps:$4 sm:$0xff]   ;;  %s1391_s23 = scalar_lea.sflag [#allocation3], %s417_s30 }
  0x1f   : > { %1583 = vmatpush3.bf16.msra.mxu1 %v1795_v15  ;;  %893 = vmatprep.mubr.bf16.mxu0 %v1484_v33  ;;  %v1488_v53 = vcombine.high %v432_v51, %v432_v51  ;;  %v1828_v54 = vld [vmem:[%s2341_s2 + $0x128] sm:$0xff]   ;;  %v1829_v55 = vld [vmem:[%s2341_s2 + $0x170] sm:$0xff]   ;;  %v1831_v57 = vld [vmem:[%s2341_s2 + $0x178] sm:$0xff]   ;;  %v1487_v59 = vcombine.low %v432_v51, %v432_v51 }
  0x20   : > { %1584 = vmatprep.subr.bf16.mxu1 %v1798_v18  ;;  %933 = vmatprep.mubr.bf16.mxu1 %v1486_v38  ;;  %v1830_v56 = vld [vmem:[%s2341_s2 + $0x130] sm:$0xff]   ;;  %v1832_v58 = vld [vmem:[%s2341_s2 + $0x138] sm:$0xff]   ;;  %v1022_v60 = vld [vmem:[%s2343_s4] sm:$0xff] }
  0x21   : > { %1563 = vmatpush3.bf16.msra.mxu0 %v1797_v17  ;;  %v1023_v61 = vld [vmem:[%s2343_s4 + $0x8] sm:$0xff]  ;;  %v1024_v62 = vld [vmem:[%s2343_s4 + $0x10] sm:$0xff]  ;;  %v1025_v1 = vld [vmem:[%s2343_s4 + $0x18] sm:$0xff] }
  0x22   : > { %1564 = vmatprep.subr.bf16.mxu0 %v1800_v20  ;;  %v1705_v0 = vpack.c.bf16 %v1023_v61, %v1022_v60  ;;  %v1708_v2 = vpack.c.bf16 %v1025_v1, %v1024_v62  ;;  %v1026_v3 = vld [vmem:[%s2343_s4 + $0x20] sm:$0xff]  ;;  %v1027_v4 = vld [vmem:[%s2343_s4 + $0x28] sm:$0xff]  ;;  %v1028_v6 = vld [vmem:[%s2343_s4 + $0x30] sm:$0xff] }
  0x23   : > { %1585 = vmatpush3.bf16.msra.mxu1 %v1799_v19  ;;  %v1711_v5 = vpack.c.bf16 %v1027_v4, %v1026_v3  ;;  %v1029_v7 = vld [vmem:[%s2343_s4 + $0x38] sm:$0xff]  ;;  %v1482_v10 = vld [vmem:[%s2342_s3] ss:$0 sm:$0xff]  ;;  %v1112_v33 = vld [vmem:[%s2345_s6 + $0x8] sm:$0xff] }
  0x24   : > { %1586 = vmatprep.subr.bf16.mxu1 %v1802_v22  ;;  %v1714_v8 = vpack.c.bf16 %v1029_v7, %v1028_v6  ;;  %v1114_v38 = vld [vmem:[%s2345_s6 + $0x18] sm:$0xff]  ;;  %vm1730_vm5 = vmpackc.low %vm1215_vm3, %vm1909_vm4  ;;  %v1291_v1 = vld [vmem:[%s2349_s10 + $0x8] sm:$0xf] }
  0x25   : > { %1565 = vmatpush3.bf16.msra.mxu0 %v1801_v21  ;;  %vm1734_vm8 = vmpackc.low %vm1303_vm7, %vm1909_vm4  ;;  %v1544_v3 = vld [vmem:[%s2348_s9] ss:$0 sm:$0xff] }
  0x26   : > { %1566 = vmatprep.subr.bf16.mxu0 %v1804_v24  ;;  %v1547_v7 = vld [vmem:[%s2350_s11] ss:$0 sm:$0xff] }
  0x27   : > { %1587 = vmatpush3.bf16.msra.mxu1 %v1803_v23 }
  0x28   : > { %1588 = vmatprep.subr.bf16.mxu1 %v1806_v26 }
  0x29   : > { %1567 = vmatpush3.bf16.msra.mxu0 %v1805_v25 }
  0x2a   : > { %1568 = vmatprep.subr.bf16.mxu0 %v1808_v28 }
  0x2b   : > { %1589 = vmatpush3.bf16.msra.mxu1 %v1807_v27 }
  0x2c   : > { %1590 = vmatprep.subr.bf16.mxu1 %v1810_v30 }
  0x2d   : > { %1569 = vmatpush3.bf16.msra.mxu0 %v1809_v29 }
  0x2e   : > { %1598 = vmatprep.subr.bf16.mxu0 %v1815_v35 }
  0x2f   : > { %1591 = vmatpush3.bf16.msra.mxu1 %v1814_v34 }
  0x30   : > { %894 = vmatmul.mubr.bf16.vlgmr.msra.gmra.mrb[0].mxu0 %v1483_v32  ;;  %1646 = vmatprep.subr.bf16.mxu1 %v1906_v41  ;;  %v1111_v32 = vld [vmem:[%s2345_s6] sm:$0xff] }
  0x31   : > { %1599 = vmatpush3.bf16.msra.mxu0 %v1818_v39  ;;  %973 = vmatprep.mubr.bf16.mxu0 %v1488_v53  ;;  %v1717_v35 = vpack.c.bf16 %v1112_v33, %v1111_v32 }
  0x32   : > { %934 = vmatmul.mubr.bf16.vlgmr.msra.gmra.mrb[0].mxu1 %v1485_v37  ;;  %1600 = vmatprep.subr.bf16.mxu0 %v1819_v40  ;;  %v1113_v37 = vld [vmem:[%s2345_s6 + $0x10] sm:$0xff]  ;;  %v1115_v40 = vld [vmem:[%s2345_s6 + $0x20] sm:$0xff] }
  0x33   : > { %1648 = vmatprep.mubr.msk.bf16.mxu1 %vm1907_vm0, %v1906_v41  ;;  %1647 = vmatpush3.bf16.msra.mxu1 %v1833_v50  ;;  %v1720_v39 = vpack.c.bf16 %v1114_v38, %v1113_v37 }
  0x34   : > { %1704 = vmatprep.subr.bf16.mxu1 %v1908_v63 }
  0x35   : > { %1601 = vmatpush3.bf16.msra.mxu0 %v1820_v42  ;;  %v1116_v42 = vld [vmem:[%s2345_s6 + $0x28] sm:$0xff] }
  0x36   : > { %1602 = vmatprep.subr.bf16.mxu0 %v1821_v43  ;;  %v1723_v43 = vpack.c.bf16 %v1116_v42, %v1115_v40 }
  0x39   : > { %1603 = vmatpush3.bf16.msra.mxu0 %v1822_v44  ;;  %v1117_v44 = vld [vmem:[%s2345_s6 + $0x30] sm:$0xff] }
  0x3a   : > { %1604 = vmatprep.subr.bf16.mxu0 %v1823_v45  ;;  %1649 = vmatmul.mubr.msk.bf16.vlgmr.msra.gmra.mrb[4].mxu1 %vm857_vm1, %v1813_v52  ;;  %v1118_v45 = vld [vmem:[%s2345_s6 + $0x38] sm:$0xff]  ;;  %v1542_v52 = vld [vmem:[%s2346_s7] ss:$0 sm:$0xff] }
  0x3b   : > { %1668 = vmatprep.mubr.msk.f32.mxu1 %vm1907_vm0, %v1906_v41  ;;  %1706 = vmatpush3.bf16.msra.mxu1 %v1705_v0  ;;  %v1290_v0 = vld [vmem:[%s2349_s10] sm:$0xff] }
  0x3c   : > { %1707 = vmatprep.subr.bf16.mxu1 %v1908_v63 }
  0x3d   : > { %1605 = vmatpush3.bf16.msra.mxu0 %v1824_v46  ;;  %v1726_v46 = vpack.c.bf16 %v1118_v45, %v1117_v44 }
  0x3e   : > { %1606 = vmatprep.subr.bf16.mxu0 %v1825_v47  ;;  %v1202_v47 = vld [vmem:[%s2347_s8] sm:$0xff] }
  0x3f   : > { %1709 = vmatpush3.bf16.msra.mxu1 %v1708_v2  ;;  %v1733_v2 = vpack.c.bf16 %v1291_v1, %v1290_v0 }
  0x40   : > { %1710 = vmatprep.subr.bf16.mxu1 %v1908_v63 }
  0x41   : > { %1607 = vmatpush3.bf16.msra.mxu0 %v1826_v48  ;;  %v1203_v48 = vld [vmem:[%s2347_s8 + $0x8] sm:$0x7f] }
  0x42   : > { %1608 = vmatprep.subr.bf16.mxu0 %v1827_v49  ;;  %v1729_v49 = vpack.c.bf16 %v1203_v48, %v1202_v47 }
  0x43   : > { %1712 = vmatpush3.bf16.msra.mxu1 %v1711_v5 }
  0x44   : > { %1713 = vmatprep.subr.bf16.mxu1 %v1908_v63 }
  0x45   : > { %1609 = vmatpush3.bf16.msra.mxu0 %v1828_v54 }
  0x46   : > { %1610 = vmatprep.subr.bf16.mxu0 %v1829_v55 }
  0x47   : > { %1715 = vmatpush3.bf16.msra.mxu1 %v1714_v8 }
  0x48   : > { %1716 = vmatprep.subr.bf16.mxu1 %v1908_v63 }
  0x49   : > { %1611 = vmatpush3.bf16.msra.mxu0 %v1830_v56 }
  0x4a   : > { %1612 = vmatprep.subr.bf16.mxu0 %v1831_v57 }
  0x4d   : > { %1613 = vmatpush3.bf16.msra.mxu0 %v1832_v58  ;;  %v1199_v58 = vld [vmem:[%s428_s29] sm:$0xff]  ;;  %s1479_s29 = sshll.u32 %s417_s30, 3 }
  0x4e   : > { %1728 = vmatprep.subr.bf16.mxu0 %v1908_v63  ;;  %s419_s18 = scalar_lea.vmem [#allocation2], %s1479_s29 }
  0x4f   : > { %s1404_s19 = sshll.u32 %s419_s18, 4  ;;  %s2298_s19 = int_to_ptr.vmem [resolvable:$true] %s1404_s19 }
  0x50   : > { %974 = vmatmul.mubr.bf16.vlgmr.msra.gmra.mrb[4].mxu0 %v1487_v59  ;;  %v1540_v59 = vld [vmem:[%s2344_s5] ss:$0 sm:$0xff]  ;;  %s1842_s27 = scalar_lea.vmem %s2298_s19, 128  ;;  %p1849_p0 = scmp.lt.s32.totalorder %s2298_s19, %s1847_s16 }
  0x51   : > { %1694 = vmatprep.mubr.msk.f32.mxu0 %vm1907_vm0, %v1906_v41  ;;  %1731 = vmatpush3.bf16.msk.msra.mxu0 %vm1730_vm5, %v1729_v49  ;;  %p1843_p11 = scmp.ne.s32.totalorder %s2298_s19, %s1842_s27  ;;  %p1850_p1 = scmp.lt.s32.totalorder %s1848_s28, %s1842_s27 }
  0x52   : > { %1732 = vmatprep.subr.bf16.mxu0 %v1908_v63 }
  0x53   : > { %p1844_p12 = pnand %p1843_p11, %p2014_p5  ;;  %p1851_p2 = por %p1850_p1, %p1849_p0 }
  0x55   : > { %p1845_p13 = pneg %p1844_p12 }
  0x57   : > { %p1852_p3 = pnand %p1851_p2, %p1845_p13 }
 0x103   : > { %v1570_v9 = vpop.f32.mrb[0].mxu0 }
 0x104   : > { %v1571_v11 = vpop.f32.mrb[1].mxu0 }
 0x105   : > { %v1572_v12 = vadd.f32 %v1571_v11, %v1570_v9  ;;  %v1573_v13 = vpop.f32.mrb[2].mxu0  ;;  %v1592_v14 = vpop.f32.mrb[0].mxu1 }
 0x106   : > { %v1574_v15 = vpop.f32.mrb[3].mxu0  ;;  %v1593_v17 = vpop.f32.mrb[1].mxu1 }
 0x107   : > { %v896_v16 = vadd.f32 %v1572_v12, %v1482_v10  ;;  %v1594_v18 = vadd.f32 %v1593_v17, %v1592_v14  ;;  %v1595_v19 = vpop.f32.mrb[2].mxu1 }
 0x108   : > { %v1596_v20 = vpop.f32.mrb[3].mxu1 }
 0x109   : > { %v936_v21 = vadd.f32 %v1594_v18, %v896_v16 }
 0x10d   : > { %v1015_v22 = vpop.f32.mrb[4].mxu1 }
 0x10e   : > { %v1650_v23 = vpop.f32.mrb[5].mxu1 }
 0x10f   : > { %v1018_v24 = vpop.f32.mrb[6].mxu1 }
 0x110   : > { %v1651_v25 = vpop.f32.mrb[7].mxu1 }
 0x123   : > { %v1614_v26 = vpop.f32.mrb[4].mxu0 }
 0x124   : > { %v1615_v27 = vpop.f32.mrb[5].mxu0 }
 0x125   : > { %v1616_v28 = vadd.f32 %v1615_v27, %v1614_v26  ;;  %v1617_v29 = vpop.f32.mrb[6].mxu0 }
 0x126   : > { %v1618_v30 = vpop.f32.mrb[7].mxu0 }
 0x127   : > { %v976_v31 = vadd.f32 %v1616_v28, %v936_v21 }
 0x129   : > { %v1016_v34 = vadd.f32 %v1015_v22, %v976_v31 }
 0x12b   : > { %v1021_v36 = vmax.f32 %v1016_v34, 0.0 }
 0x12d   : > { %1669 = vmatmul.mubr.msk.f32.vlgmr.msra.gmra.mrb[8].mxu1 %vm1037_vm2, %v1021_v36 }
 0x12e   : > { %1718 = vmatpush3.bf16.msra.mxu1 %v1717_v35  ;;  %1687 = vmatprep.mubr.msk.f32.mxu1 %vm1907_vm0, %v1906_v41 }
 0x12f   : > { %1719 = vmatprep.subr.bf16.mxu1 %v1908_v63 }
 0x132   : > { %1721 = vmatpush3.bf16.msra.mxu1 %v1720_v39 }
 0x133   : > { %1722 = vmatprep.subr.bf16.mxu1 %v1908_v63 }
 0x136   : > { %1724 = vmatpush3.bf16.msra.mxu1 %v1723_v43 }
 0x137   : > { %1725 = vmatprep.subr.bf16.mxu1 %v1908_v63 }
 0x13a   : > { %1727 = vmatpush3.bf16.msra.mxu1 %v1726_v46 }
 0x13d   : > { %1688 = vmatmul.mubr.msk.f32.vlgmr.msra.gmra.mrb[10].mxu1 %vm1037_vm2, %v1021_v36 }
 0x200   : > { %v1107_v50 = vpop.f32.mrb[8].mxu1 }
 0x201   : > { %v1670_v51 = vpop.f32.mrb[9].mxu1  ;;  %v1108_v61 = vadd.f32 %v1540_v59, %v1107_v50 }
 0x210   : > { %v1192_v53 = vpop.f32.mrb[10].mxu1 }
 0x211   : > { %v1193_v54 = vadd.f32 %v1542_v52, %v1192_v53  ;;  %v1689_v55 = vpop.f32.mrb[11].mxu1 }
 0x213   : > { %v1196_v56 = vmul.f32 0.5, %v1193_v54 }
 0x215   : > { %v1197_v57 = vmul.f32 1.442695, %v1196_v56 }
 0x217   : > { %1836 = vpow2.f32 %v1197_v57 }
 0x221   : > { %v1837_v60 = vpop.eup %1836 }
 0x222   : > { %v1200_v62 = vmul.f32 %v1837_v60, %v1199_v58 }
 0x224   : > { %v1201_v63 = vadd.f32 %v1200_v62, %v1108_v61 }
 0x226   : > { %1695 = vmatmul.mubr.msk.f32.vlgmr.msra.gmra.mrb[8].mxu0 %vm1211_vm6, %v1201_v63 }
 0x227   : > { %1701 = vmatprep.mubr.msk.f32.mxu0 %vm1907_vm0, %v1906_v41  ;;  %1735 = vmatpush3.bf16.msk.msra.mxu0 %vm1734_vm8, %v1733_v2 }
 0x2f9   : > { %v1285_v4 = vpop.f32.mrb[8].mxu0 }
 0x2fa   : > { %v1286_v5 = vadd.f32 %v1544_v3, %v1285_v4  ;;  %v1696_v41 = vpop.f32.mrb[9].mxu0 }
 0x2fc   : > { %v1289_v6 = vmax.f32 %v1286_v5, 0.0 }
 0x2fe   : > { %1702 = vmatmul.mubr.msk.f32.vlgmr.msra.gmra.mrb[10].mxu0 %vm1299_vm9, %v1289_v6 }
 0x3d1   : > { %v1373_v8 = vpop.f32.mrb[10].mxu0 }
 0x3d2   : > { %v1374_v9 = vadd.f32 %v1547_v7, %v1373_v8  ;;  %v1703_v10 = vpop.f32.mrb[11].mxu0 }
 0x3d4   : > { %v1378_v11 = vsel %vm1377_vm10, %v1374_v9, -inf }
 0x3d5   : > { %1379 = vmax.xlane.f32.xlu0 %v1378_v11 }
 0x462   : > { %v1380_v12 = vpop.xlane.xlu0 %1379 }
 0x463   : > { %v1381_v13 = vsub.f32 %v1374_v9, %v1380_v12 }
 0x465   : > { %v1382_v14 = vmul.f32 1.442695, %v1381_v13 }
 0x467   : > { %1838 = vpow2.f32 %v1382_v14 }
 0x471   : > { %v1839_v15 = vpop.eup %1838 }
 0x472   : > { %v1384_v16 = vsel %vm1377_vm10, %v1839_v15, 0.0 }
 0x473   : > { %1385 = vadd.xlane.f32.xlu0 %v1384_v16 }
 0x500   : > { %v1386_v17 = vpop.xlane.xlu0 %1385 }
 0x501   : > { %1840 = vrcp.f32 %v1386_v17 }
 0x50b   : > { %v1841_v18 = vpop.eup %1840 }
 0x50c   : > { %v1388_v19 = vmul.f32 %v1841_v18, %v1839_v15 }
 0x50e   : > { %1389 = vst.msk [vmem:[%s419_s18] sm:$0xff] %vm1377_vm10, %v1388_v19 }
 0x50f   : > { %1855 = shalt.err (!%p1852_p3)
}
 0x510   : > { %s1856_s30 = scalar_lea.hbm %s2296_s26, 128  ;;  %s1860_s18 = scalar_lea.hbm %s2351_s12, 256 }
 0x511   : > { %p1857_p4 = scmp.ne.s32.totalorder %s2296_s26, %s1856_s30  ;;  %p1861_p9 = scmp.lt.u32.totalorder %s2296_s26, %s2351_s12 }
 0x512   : > { %p1862_p10 = scmp.lt.u32.totalorder %s1860_s18, %s1856_s30  ;;  %p1864_p12 = scmp.lt.u32.totalorder %s1856_s30, %s2296_s26 }
 0x513   : > { %p1858_p7 = pnand %p1857_p4, %p2014_p5 }
 0x514   : > { %p1863_p11 = por %p1862_p10, %p1861_p9 }
 0x515   : > { %p1859_p8 = pneg %p1858_p7 }
 0x516   : > { %p1865_p13 = por %p1864_p12, %p1863_p11 }
 0x518   : > { %p1866_p0 = pnand %p1865_p13, %p1859_p8 }
 0x51a   : > { %1869 = shalt.err (!%p1866_p0)
}
 0x51b   : > { %1737 = dma.vmem_to_hbm [thread:$0]  (%p2014_p5), %s2298_s19, 128, %s2296_s26, %s1391_s23  }
 0x51c PF: > { %p1743_p1 = scmp.ge.s32.totalorder %s1904_s24, 2  ;;  %s1416_s27 = sand.u32 1, %s1892_s21  }
 0x51d   : > { %s1417_s25 = scalar_lea.sflag [#allocation3], %s1416_s27 }
 0x51e   : > { %p1740_p2 = pnand %p1743_p1, %p2018_p6 }
 0x520   : > { %1887 = dma.done.wait (!%p1740_p2), %s1417_s25, 128  }
 0x521   : > { %1889 = vsyncadd (!%p1740_p2), %s1417_s25, 4294967168  ;;  %s2360_s24 = sld [smem:[#allocation6_spill]]  ;;  %s2361_s16 = sld [smem:[#allocation5_spill]] }
 0x522   : > { %s2362_s23 = sld [smem:[#allocation7_spill]]  ;;  %s2363_s21 = smov %s1896_s22 }
 0x527   : > { %p22_p3 = scmp.ge.s32.totalorder %s2360_s24, 4   ;;  %s2364_s22 = smov %s2361_s16 }
 0x529   :  { %24 = sbr.rel (!%p22_p3) target bundleno = 3 (0x3), region = 106 }
 0x530   :  { %1422 = vsyncpa [#allocation3], 1 }
 0x531   :  { %1424 = vsyncpa [#allocation3 + $0x1], 1 }

</bundles_post_ra>
